<compile_context>
chip_gen: v7x
topology: tpu7x:2x2x1
jax: 0.10.0
libtpu: 0.0.40
codegen_flags: <defaults>
</compile_context>

<pallas_src>
import jax
import jax.numpy as jnp
from jax.experimental import pallas as pl
from jax.experimental.pallas import tpu as pltpu


def packed_linear_kernel(x_ref, w_ref, b_ref, o_ref):
    """y_packed = x_packed @ w_big + b  (Linear(K, 1) with 12-row lane packing).

    x_ref: (TBp, PACK*K) f32 VMEM   -- 12 original batch rows per packed row
    w_ref: (PACK*K, PACK) f32 VMEM  -- block-diagonal weight, w[g*K+j, g] = w_j
    b_ref: (1,)          f32 SMEM   -- scalar bias
    o_ref: (TBp, PACK)   f32 VMEM   -- 12 outputs per packed row
    """
    acc = jnp.dot(x_ref[...], w_ref[...], preferred_element_type=jnp.float32)
    o_ref[...] = (acc + b_ref[0]).astype(o_ref.dtype)


def dummy_model_forward(x, weight, bias, *, packed_row_tile=4096):
    """nn.Linear(10, 1).forward(x) == x @ weight.T + bias.

    x:      (B, 10) float32
    weight: (1, 10) float32   (PyTorch layout: (out_features, in_features))
    bias:   (1,)    float32
    returns (B, 1)  float32
    """
    B, K = x.shape
    N, K_w = weight.shape
    assert K_w == K and N == 1 and bias.shape == (N,)
    assert K <= 128

    dtype = x.dtype
    pack = max(1, 128 // K)          # 12 for K=10: batch rows packed per vreg row

    # Pad batch up to a multiple of the pack factor (no-op when aligned), then
    # view as (Bp, pack*K) — metadata-only since rows are contiguous.
    b_pad = pl.cdiv(B, pack) * pack
    if b_pad != B:
        x = jnp.pad(x, ((0, b_pad - B), (0, 0)))
    bp = b_pad // pack
    x_packed = x.reshape(bp, pack * K)

    # Block-diagonal weight so a single MXU dot performs both the
    # broadcast-multiply and the segmented 10-lane reduction.
    w_vec = weight.reshape(K).astype(dtype)
    w_big = (jnp.eye(pack, dtype=dtype)[:, None, :]
             * w_vec[None, :, None]).reshape(pack * K, pack)
    b_sc = bias.reshape(N).astype(dtype)

    # Per-tile footprint at tbp=4096: x (4096,128-padded) = 2 MiB/buffer,
    # out (4096,128-padded) = 2 MiB/buffer -> ~8.5 MiB double-buffered total.
    tbp = bp if bp <= packed_row_tile else packed_row_tile
    grid = (pl.cdiv(bp, tbp),)       # tail-safe: ragged last block is fine

    y_packed = pl.pallas_call(
        packed_linear_kernel,
        out_shape=jax.ShapeDtypeStruct((bp, pack), dtype),
        grid=grid,
        in_specs=[
            pl.BlockSpec((tbp, pack * K), lambda i: (i, 0)),      # x tile
            pl.BlockSpec((pack * K, pack), lambda i: (0, 0)),     # resident weight
            pl.BlockSpec(memory_space=pltpu.MemorySpace.SMEM),    # bias scalar
        ],
        out_specs=pl.BlockSpec((tbp, pack), lambda i: (i, 0)),
        compiler_params=pltpu.CompilerParams(
            dimension_semantics=("parallel",),
            vmem_limit_bytes=32 * 1024 * 1024,
        ),
    )(x_packed, w_big, b_sc)

    # (Bp, pack) -> (B_pad, 1) is metadata-only; slice off any tail padding.
    return y_packed.reshape(b_pad, N)[:B]


if __name__ == "__main__":
    key = jax.random.PRNGKey(0)
    kx, kw, kb, kx2 = jax.random.split(key, 4)

    IN, OUT = 10, 1

    # Deterministic "parameters" matching nn.Linear(10, 1) shapes.
    weight = jax.random.normal(kw, (OUT, IN), dtype=jnp.float32) * 0.1
    bias = jax.random.normal(kb, (OUT,), dtype=jnp.float32) * 0.1

    # Small batch aligned to the 12-row pack factor.
    B = 24
    x = jax.random.normal(kx, (B, IN), dtype=jnp.float32)
    y = dummy_model_forward(x, weight, bias)
    jax.block_until_ready(y)
    y_ref = x @ weight.T + bias
    assert y.shape == (B, OUT)
    assert jnp.allclose(y, y_ref, atol=1e-5, rtol=1e-5)

    # Ragged batch: exercises the zero-pad + tail-slice path.
    B2 = 7
    x2 = jax.random.normal(kx2, (B2, IN), dtype=jnp.float32)
    y2 = dummy_model_forward(x2, weight, bias)
    jax.block_until_ready(y2)
    y2_ref = x2 @ weight.T + bias
    assert y2.shape == (B2, OUT)
    assert jnp.allclose(y2, y2_ref, atol=1e-5, rtol=1e-5)

    print("KERNEL_OK")
</pallas_src>

<mosaic_0001>
module attributes {stable_mosaic.version = 11 : i64} {
  func.func @packed_linear_kernel(%arg0: i32, %arg1: memref<2x120xf32, #tpu.memory_space<vmem>>, %arg2: memref<120x12xf32, #tpu.memory_space<vmem>>, %arg3: memref<1xf32, #tpu.memory_space<smem>>, %arg4: memref<2x12xf32, #tpu.memory_space<vmem>>) attributes {dimension_semantics = [#tpu.dimension_semantics<parallel>], iteration_bounds = array<i64: 1>, scalar_prefetch = 0 : i64, scratch_operands = 0 : i64, tpu.core_type = #tpu.core_type<tc>, window_params = [{transform_indices = @transform_0, window_bounds = array<i64: 2, 120>}, {pipeline_mode = #tpu.pipeline_mode<synchronous>, transform_indices = @transform_1, window_bounds = array<i64: 120, 12>}, {transform_indices = @transform_2, window_bounds = array<i64: 1>}, {transform_indices = @transform_3, window_bounds = array<i64: 2, 12>}]} {
    %c0 = arith.constant 0 : index
    %c0_0 = arith.constant 0 : index
    %0 = vector.load %arg1[%c0, %c0_0] : memref<2x120xf32, #tpu.memory_space<vmem>>, vector<2x120xf32>
    %c0_1 = arith.constant 0 : index
    %c0_2 = arith.constant 0 : index
    %1 = vector.load %arg2[%c0_1, %c0_2] : memref<120x12xf32, #tpu.memory_space<vmem>>, vector<120x12xf32>
    %cst = arith.constant dense<0.000000e+00> : vector<2x12xf32>
    %2 = tpu.matmul %0, %1, %cst {dimension_numbers = #tpu.dot_dimension_numbers<[1], [0], [0], [1], [0, 0, 1, 1], [], []>} : vector<2x120xf32>, vector<120x12xf32>, vector<2x12xf32> -> vector<2x12xf32>
    %c0_3 = arith.constant 0 : index
    %3 = memref.load %arg3[%c0_3] : memref<1xf32, #tpu.memory_space<smem>>
    %4 = vector.broadcast %3 : f32 to vector<2x12xf32>
    %5 = arith.addf %2, %4 : vector<2x12xf32>
    %c0_4 = arith.constant 0 : index
    %c0_5 = arith.constant 0 : index
    %6 = vector.load %arg4[%c0_4, %c0_5] : memref<2x12xf32, #tpu.memory_space<vmem>>, vector<2x12xf32>
    tpu.vector_store %arg4[%c0_4, %c0_5], %5 {strides = array<i32>} : memref<2x12xf32, #tpu.memory_space<vmem>>, vector<2x12xf32>,
    return
  }
  func.func @transform_0(%arg0: i32) -> (i32, i32) {
    %c0_i32 = arith.constant 0 : i32
    %c0_i32_0 = arith.constant 0 : i32
    return %arg0, %c0_i32 : i32, i32
  }
  func.func @transform_1(%arg0: i32) -> (i32, i32) {
    %c0_i32 = arith.constant 0 : i32
    %c0_i32_0 = arith.constant 0 : i32
    %c0_i32_1 = arith.constant 0 : i32
    return %c0_i32, %c0_i32_0 : i32, i32
  }
  func.func @transform_2(%arg0: i32) -> i32 {
    %c0_i32 = arith.constant 0 : i32
    %c0_i32_0 = arith.constant 0 : i32
    return %c0_i32 : i32
  }
  func.func @transform_3(%arg0: i32) -> (i32, i32) {
    %c0_i32 = arith.constant 0 : i32
    %c0_i32_0 = arith.constant 0 : i32
    return %arg0, %c0_i32 : i32, i32
  }
}

</mosaic_0001>

<bundles_post_ra>
// kernel: tpu_custom_call.1
= control target key start
LH: loop header
LB: loop body
LE: loop exit
PB: predicated region body
PF: predicated region fallthrough
CT: control target
= control target key end

     0   :  { %v223_v3 = vmov 0.0|0.0   ;;  %vm224_vm0 = vmmov 0   ;;  %v225_v6 = vmov 0.0   ;;  %s310_s0 = inlined_call_operand.vmem [shape: f32[2,120], index: 0, kind: input, shape index: {}]   ;;  %s311_s1 = inlined_call_operand.vmem [shape: f32[120,12], index: 1, kind: input, shape index: {}]   ;;  %s312_s2 = inlined_call_operand.<no memory space> [shape: f32[1], index: 2, kind: input, shape index: {}]   ;;  %s313_s3 = inlined_call_operand.hbm [shape: f32[2,12], index: 3, kind: output, shape index: {}]  }
   0x1   :  { %v17_v0 = vld [vmem:[%s311_s1] sm:$0xff]  ;;  %v18_v1 = vld [vmem:[%s311_s1 + $0x8] sm:$0xff]  ;;  %v19_v2 = vld [vmem:[%s311_s1 + $0x10] sm:$0xff]  ;;  %174 = vmatprep.subr.bf16.mxu0 %v223_v3  ;;  %171 = vmatprep.mubr.msk.f32.mxu0 %vm224_vm0, %v225_v6 }
   0x2   :  { %v175_v4 = vpack.c.bf16 %v18_v1, %v17_v0  ;;  %v20_v5 = vld [vmem:[%s311_s1 + $0x18] sm:$0xff]  ;;  %v21_v8 = vld [vmem:[%s311_s1 + $0x20] sm:$0xff]  ;;  %v22_v9 = vld [vmem:[%s311_s1 + $0x28] sm:$0xff] }
   0x3   :  { %v178_v7 = vpack.c.bf16 %v20_v5, %v19_v2 }
   0x4   :  { %176 = vmatpush3.bf16.msra.mxu0 %v175_v4 }
   0x5   :  { %177 = vmatprep.subr.bf16.mxu0 %v223_v3 }
   0x6   :  { %9 = vsyncpa [#allocation4], 0  ;;  %v181_v10 = vpack.c.bf16 %v22_v9, %v21_v8  ;;  %v23_v11 = vld [vmem:[%s311_s1 + $0x30] sm:$0xff]  ;;  %v24_v12 = vld [vmem:[%s311_s1 + $0x38] sm:$0xff]  ;;  %vm34_vm1 = vcmask 982016   ;;  %v33_v25 = vstv %s312_s2  ;;  %s226_s19 = smov [#allocation3]  }
   0x7   :  { %v184_v13 = vpack.c.bf16 %v24_v12, %v23_v11  ;;  %v25_v14 = vld [vmem:[%s311_s1 + $0x40] sm:$0xff]  ;;  %v26_v15 = vld [vmem:[%s311_s1 + $0x48] sm:$0xff]  ;;  %v27_v17 = vld [vmem:[%s311_s1 + $0x50] sm:$0xff]  ;;  %s116_s20 = sshll.u32 %s226_s19, 4  ;;  %vm108_vm2 = vcmask 91136   ;;  %s117_s20 = int_to_ptr.vmem [resolvable:$true] %s116_s20 }
   0x8   :  { %179 = vmatpush3.bf16.msra.mxu0 %v178_v7  ;;  %v187_v16 = vpack.c.bf16 %v26_v15, %v25_v14  ;;  %v28_v18 = vld [vmem:[%s311_s1 + $0x58] sm:$0xff]  ;;  %v29_v20 = vld [vmem:[%s311_s1 + $0x60] sm:$0xff]  ;;  %v30_v21 = vld [vmem:[%s311_s1 + $0x68] sm:$0xff]  ;;  %p204_p1 = scmp.lt.s32.totalorder %s117_s20, %s117_s20 }
   0x9   :  { %180 = vmatprep.subr.bf16.mxu0 %v223_v3  ;;  %v190_v19 = vpack.c.bf16 %v28_v18, %v27_v17  ;;  %v193_v22 = vpack.c.bf16 %v30_v21, %v29_v20  ;;  %v31_v23 = vld [vmem:[%s311_s1 + $0x70] sm:$0xff]  ;;  %v16_v24 = vld [vmem:[%s310_s0] sm:$0x3]  ;;  %s199_s1 = scalar_lea.vmem %s117_s20, 32 }
   0xa   :  { %p200_p0 = scmp.ne.s32.totalorder %s117_s20, %s199_s1  ;;  %p205_p2 = scmp.lt.s32.totalorder %s199_s1, %s199_s1 }
   0xc   :  { %182 = vmatpush3.bf16.msra.mxu0 %v181_v10  ;;  %p206_p3 = por %p205_p2, %p204_p1 }
   0xd   :  { %183 = vmatprep.subr.bf16.mxu0 %v223_v3 }
   0xe   :  { %p207_p4 = pnand %p206_p3, %p200_p0 }
  0x10   :  { %185 = vmatpush3.bf16.msra.mxu0 %v184_v13 }
  0x11   :  { %186 = vmatprep.subr.bf16.mxu0 %v223_v3 }
  0x14   :  { %188 = vmatpush3.bf16.msra.mxu0 %v187_v16 }
  0x15   :  { %189 = vmatprep.subr.bf16.mxu0 %v223_v3 }
  0x18   :  { %191 = vmatpush3.bf16.msra.mxu0 %v190_v19 }
  0x19   :  { %192 = vmatprep.subr.bf16.mxu0 %v223_v3 }
  0x1c   :  { %194 = vmatpush3.bf16.msra.mxu0 %v193_v22 }
  0x1d   :  { %169 = vmatprep.subr.mxu0 %v225_v6 }
  0x20   :  { %170 = vmatpush3.msra.mxu0 %v31_v23 }
  0x21   :  { %172 = vmatmul.mubr.msk.f32.vlgmr.msra.gmra.mrb[0].mxu0 %vm34_vm1, %v16_v24 }
  0xf4   :  { %v104_v26 = vpop.f32.mrb[0].mxu0 }
  0xf5   :  { %v105_v27 = vadd.f32 %v104_v26, %v33_v25  ;;  %v173_v28 = vpop.f32.mrb[1].mxu0 }
  0xf7   :  { %109 = vst.msk [vmem:[#allocation3] sm:$0x3] %vm108_vm2, %v105_v27 }
  0xf8   :  { %210 = shalt.err (!%p207_p4)
}
  0xf9   :  { %s211_s22 = scalar_lea.hbm %s313_s3, 32 }
  0xfa   :  { %p212_p5 = scmp.ne.s32.totalorder %s313_s3, %s211_s22  ;;  %p215_p6 = scmp.lt.u32.totalorder %s211_s22, %s313_s3 }
  0xfc   :  { %p217_p7 = pnand %p215_p6, %p212_p5 }
  0xfe   :  { %220 = shalt.err (!%p217_p7)
}
  0xff   :  { %119 = dma.vmem_to_hbm [thread:$0]  %s117_s20, 32, %s313_s3, [#allocation4]  }
 0x100   :  { %221 = dma.done.wait [#allocation4], 32  }
 0x101   :  { %222 = vsyncadd [#allocation4], 4294967264 }
 0x102   :  { %123 = vsyncpa [#allocation4], 1 }

</bundles_post_ra>
